<compile_context>
chip_gen: v6e
topology: v6e:2x2x1
jax: 0.10.0
libtpu: 0.0.40
codegen_flags: <defaults>
</compile_context>

<pallas_src>
import jax
import jax.numpy as jnp
import numpy as np
from jax import lax
from jax.experimental import pallas as pl
from jax.experimental.pallas import tpu as pltpu

SQRT_2_OVER_PI = 0.7978845608028654
LN_EPS = 1e-12  # BERT LayerNorm eps


def _gelu(x):
    # TODO(synk): tanh approximation used in place of BERT's erf-based GELU.
    return 0.5 * x * (1.0 + jnp.tanh(SQRT_2_OVER_PI * (x + 0.044715 * x * x * x)))


def _score_psgs_kernel(hid_ref,    # VMEM (1, Bq, S, H)  bf16  hidden states
                       start_ref,  # VMEM (1, Bq, Pp, 1) i32   span start (token idx)
                       end_ref,    # VMEM (1, Bq, Pp, 1) i32   span end   (token idx)
                       scale_ref,  # VMEM (1, Bq, Pp, 1) f32   1/count
                       wt_ref,     # VMEM (H, H)  bf16  dense weight, (in, out)
                       bt_ref,     # VMEM (1, H)  f32   dense bias
                       wr_ref,     # VMEM (H, 1)  f32   ln_gamma * rerank_w (LN affine folded)
                       br_ref,     # VMEM (1, 1)  f32   rerank_b + ln_beta . rerank_w
                       out_ref):   # VMEM (1, Bq*Pp, 1) f32 logits
    _, bq, s_len, h = hid_ref.shape
    pp = start_ref.shape[2]

    hid = hid_ref[0]          # (Bq, S, H) bf16
    start = start_ref[0]      # (Bq, Pp, 1) i32
    end = end_ref[0]          # (Bq, Pp, 1) i32
    scale = scale_ref[0]      # (Bq, Pp, 1) f32

    # Per-query 0/1 pooling mask (exactly representable in bf16); the 1/count
    # scale is applied after the matmul as a cheap width-1 broadcast.
    col = lax.broadcasted_iota(jnp.int32, (bq, pp, s_len), 2)
    inside = jnp.logical_and(col > start, col < end)
    pool = jnp.where(inside, 1.0, 0.0).astype(jnp.bfloat16)          # (Bq, Pp, S)

    # Batched pooling matmul on the bf16 MXU path, f32 accumulation.
    sums = jnp.einsum("bps,bsh->bph", pool, hid,
                      preferred_element_type=jnp.float32)            # (Bq, Pp, H) f32
    means = sums * scale                                             # (Bq, Pp, H) f32
    # Pp is a multiple of 8, so this merge is tile-aligned (no relayout copy).
    x = means.reshape(bq * pp, h).astype(jnp.bfloat16)

    # BertPredictionHeadTransform: dense(H,H) -> GELU -> LayerNorm.
    # (LayerNorm affine is folded into the reranker weights in the wrapper.)
    t = jnp.dot(x, wt_ref[...], preferred_element_type=jnp.float32) + bt_ref[...]
    t = _gelu(t)
    # One-pass LN statistics: var = E[t^2] - E[t]^2.
    mu = jnp.mean(t, axis=-1, keepdims=True)
    msq = jnp.mean(t * t, axis=-1, keepdims=True)
    var = jnp.maximum(msq - mu * mu, 0.0)
    y = (t - mu) * lax.rsqrt(var + LN_EPS)

    # Reranker: (Bq*Pp, H) @ (H, 1) -- contracts y's lane axis from the LHS so
    # the big tile is never transposed. Invalid rows are NaN'd in the wrapper.
    out_ref[0] = jnp.dot(y, wr_ref[...],
                         preferred_element_type=jnp.float32) + br_ref[...]


def _tpu_vmem_capacity_bytes():
    """Physical per-core VMEM (v5e/v6e: 128 MiB, v7x: 64 MiB); safe fallback."""
    try:
        return int(pltpu.get_tpu_info().vmem_capacity_bytes)
    except Exception:
        return 64 * 1024 * 1024


def _vmem_bytes(bq, S, H, P_pad):
    """Conservative per-step VMEM footprint estimate for the Bq chooser."""
    pad_s = -(-S // 128) * 128
    pad_h = -(-H // 128) * 128
    rows = bq * P_pad
    hid = 2 * bq * S * pad_h * 2                         # double-buffered bf16 hid block
    pool = bq * P_pad * pad_s * (4 + 4 + 2)              # i32 iota + compares/select + bf16 pool
    acts = bq * P_pad * pad_h * (4 + 4)                  # sums f32 + scaled means f32
    acts += rows * pad_h * (2 + 4 + 4)                   # bf16 dense input, t, y
    weights = 2 * (H * pad_h * 2 + 3 * pad_h * 4 + 512)  # double-buffered weights
    meta = 2 * 3 * bq * P_pad * 128 * 4                  # start/end/scale (lane-padded)
    out = 2 * rows * 128 * 4                             # lane-padded (rows, 1) output
    scratch = 2 * 1024 * 1024                            # Mosaic internal scratch headroom
    return hid + pool + acts + weights + meta + out + scratch


def _choose_queries_per_step(B, S, H, P_pad, vmem_budget_bytes, target_rows):
    """Largest Bq giving ~target_rows dense rows that fits the VMEM budget."""
    bq = min(B, max(1, -(-target_rows // P_pad)))
    while bq > 1 and _vmem_bytes(bq, S, H, P_pad) > vmem_budget_bytes:
        bq -= 1
    return bq


def score_psgs(hidden_vectors, sep_indices, params, queries_per_step=None):
    B, S, H = hidden_vectors.shape
    P = sep_indices.shape[1] - 1
    P_pad = -(-P // 8) * 8          # sublane-aligned so the in-kernel merge is free

    vmem_cap = _tpu_vmem_capacity_bytes()
    vmem_limit = min(int(0.75 * vmem_cap), 100 * 1024 * 1024)  # v7x ~48 MiB, v5e/v6e ~96 MiB

    if queries_per_step is None:
        # v6e MXU is 2x256x256 -> aim for 256 dense rows when VMEM allows;
        # 128 rows already fill an M pass on v5e/v7x.
        target_rows = 256 if vmem_cap > 96 * 1024 * 1024 else 128
        Bq = _choose_queries_per_step(B, S, H, P_pad, vmem_limit, target_rows)
        # Keep >=2 grid steps so both v7x TensorCores get work under
        # dimension_semantics=("parallel",); at most one extra ~0.35us pipeline
        # step on single-TC chips.
        if B >= 2:
            Bq = min(Bq, -(-B // 2))
    else:
        Bq = max(1, min(int(queries_per_step), B))
    G = -(-B // Bq)
    B_pad = G * Bq

    # bf16 streaming of the dominant HBM term; all matmuls accumulate in f32.
    hid = hidden_vectors.astype(jnp.bfloat16)
    sep = sep_indices.astype(jnp.int32)
    if B_pad != B:
        hid = jnp.concatenate([hid, jnp.zeros((B_pad - B, S, H), jnp.bfloat16)], axis=0)
        sep = jnp.concatenate([sep, jnp.zeros((B_pad - B, P + 1), jnp.int32)], axis=0)

    # --- tiny span metadata, computed once in plain JAX (B*P scalars) --------
    starts = sep[:, :P]                                    # (B_pad, P)
    ends = sep[:, 1:]                                      # (B_pad, P)
    valid = ends > starts + 1
    # torch loop `break` semantics: a passage is scored only if all earlier
    # passages of the same query were valid.
    prefix_valid = jnp.cumprod(valid.astype(jnp.int32), axis=1) > 0
    count = jnp.maximum(ends - starts - 1, 1).astype(jnp.float32)
    scale = 1.0 / count                                    # (B_pad, P)

    pad_cols = ((0, 0), (0, P_pad - P))
    starts_p = jnp.pad(starts, pad_cols)                   # padded slots: empty span
    ends_p = jnp.pad(ends, pad_cols)
    scale_p = jnp.pad(scale, pad_cols)

    hid_g = hid.reshape(G, Bq, S, H)
    start_g = starts_p.reshape(G, Bq, P_pad, 1)
    end_g = ends_p.reshape(G, Bq, P_pad, 1)
    scale_g = scale_p.reshape(G, Bq, P_pad, 1)

    # --- fold LayerNorm affine into the reranker (one-time, wrapper-side) ----
    wr = params["rerank_w"].reshape(-1).astype(jnp.float32)
    wt_t = params["transform_w"].astype(jnp.float32).T.astype(jnp.bfloat16)   # (H_in, H_out)
    bt = params["transform_b"].astype(jnp.float32).reshape(1, H)
    wr_eff = (params["ln_gamma"].astype(jnp.float32) * wr).reshape(H, 1)
    br_eff = (params["rerank_b"].astype(jnp.float32).reshape(())
              + jnp.dot(params["ln_beta"].astype(jnp.float32), wr)).reshape(1, 1)

    grid_spec = pltpu.PrefetchScalarGridSpec(
        num_scalar_prefetch=0,
        grid=(G,),
        in_specs=[
            pl.BlockSpec((1, Bq, S, H), lambda g: (g, 0, 0, 0)),
            pl.BlockSpec((1, Bq, P_pad, 1), lambda g: (g, 0, 0, 0)),
            pl.BlockSpec((1, Bq, P_pad, 1), lambda g: (g, 0, 0, 0)),
            pl.BlockSpec((1, Bq, P_pad, 1), lambda g: (g, 0, 0, 0)),
            # Weights: constant block index -> fetched once, stay resident.
            # TODO(synk): pipeline_mode=pl.Buffered(1) would drop their second
            # buffer; left at the default for lowering robustness.
            pl.BlockSpec((H, H), lambda g: (0, 0)),
            pl.BlockSpec((1, H), lambda g: (0, 0)),
            pl.BlockSpec((H, 1), lambda g: (0, 0)),
            pl.BlockSpec((1, 1), lambda g: (0, 0)),
        ],
        out_specs=pl.BlockSpec((1, Bq * P_pad, 1), lambda g: (g, 0, 0)),
    )

    out = pl.pallas_call(
        _score_psgs_kernel,
        out_shape=jax.ShapeDtypeStruct((G, Bq * P_pad, 1), jnp.float32),
        grid_spec=grid_spec,
        compiler_params=pltpu.CompilerParams(
            dimension_semantics=("parallel",),
            vmem_limit_bytes=int(vmem_limit),
        ),
    )(hid_g, start_g, end_g, scale_g, wt_t, bt, wr_eff, br_eff)

    logits = out.reshape(B_pad, P_pad)[:, :P]
    # NaN-fill invalid / post-break passage slots in the wrapper (touches only
    # B*P scalars, instead of an H-wide select per grid step in the kernel).
    logits = jnp.where(prefix_valid, logits, jnp.nan)
    return logits[:B]


def dqr_forward(hidden_vectors, sep_indices, params, scoring=True, queries_per_step=None):
    """Equivalent of Dqr.forward: returns (psgs_logit, hidden_vectors)."""
    psgs_logit = (score_psgs(hidden_vectors, sep_indices, params, queries_per_step)
                  if scoring else None)
    return psgs_logit, hidden_vectors


def _reference_score(hidden, sep, params):
    """Pure numpy reference mirroring torch Dqr.score_psgs semantics."""
    hidden = np.asarray(hidden, np.float32)
    sep = np.asarray(sep)
    B, S, H = hidden.shape
    P = sep.shape[1] - 1
    Wt = np.asarray(params["transform_w"], np.float32)
    bt = np.asarray(params["transform_b"], np.float32)
    g = np.asarray(params["ln_gamma"], np.float32)
    be = np.asarray(params["ln_beta"], np.float32)
    wr = np.asarray(params["rerank_w"], np.float32).reshape(-1)
    br = float(np.asarray(params["rerank_b"], np.float32).reshape(-1)[0])

    out = np.full((B, P), np.nan, np.float32)
    for q in range(B):
        for p in range(P):
            s, n = int(sep[q, p]), int(sep[q, p + 1])
            if n <= s + 1:
                break
            v = hidden[q, s + 1:n].mean(axis=0)
            t = v @ Wt.T + bt
            t = 0.5 * t * (1.0 + np.tanh(SQRT_2_OVER_PI * (t + 0.044715 * t ** 3)))
            mu = t.mean()
            var = ((t - mu) ** 2).mean()
            y = (t - mu) / np.sqrt(var + LN_EPS) * g + be
            out[q, p] = y @ wr + br
    return out


if __name__ == "__main__":
    B, S, H, P = 3, 32, 128, 4

    key = jax.random.PRNGKey(0)
    k_hid, k_w, k_b, k_g, k_be, k_r, k_rb = jax.random.split(key, 7)

    # Synthetic encoder output (stands in for BERT hidden states).
    hidden_vectors = jax.random.normal(k_hid, (B, S, H), jnp.float32)

    # Parameter shapes from BertPredictionHeadTransform + nn.Linear(H, 1).
    params = {
        "transform_w": jax.random.normal(k_w, (H, H), jnp.float32) * 0.02,
        "transform_b": jax.random.normal(k_b, (H,), jnp.float32) * 0.02,
        "ln_gamma": 1.0 + 0.1 * jax.random.normal(k_g, (H,), jnp.float32),
        "ln_beta": 0.1 * jax.random.normal(k_be, (H,), jnp.float32),
        "rerank_w": jax.random.normal(k_r, (1, H), jnp.float32) * 0.02,
        "rerank_b": 0.1 * jax.random.normal(k_rb, (1,), jnp.float32),
    }

    # q0: 4 valid passages; q1: breaks after passage 0; q2: breaks at passage 0.
    sep_indices = jnp.array([[5, 12, 20, 28, 31],
                             [4, 10, 11, 18, 25],
                             [2, 3, 9, 15, 22]], dtype=jnp.int32)

    ref = _reference_score(hidden_vectors, sep_indices, params)

    # Explicit query batching: B=3, Bq=2 exercises padding (B_pad=4) and a
    # multi-step grid (G=2). Tolerance loosened for bf16 streaming (f32 accum).
    psgs_logit, hid_out = dqr_forward(hidden_vectors, sep_indices, params,
                                      queries_per_step=2)
    jax.block_until_ready((psgs_logit, hid_out))
    np.testing.assert_allclose(np.asarray(psgs_logit), ref, rtol=3e-2, atol=2e-2)
    np.testing.assert_allclose(np.asarray(hid_out), np.asarray(hidden_vectors))

    # Auto path: generation-aware Bq chooser (+ G>=2 cap for v7x megacore).
    psgs_auto, _ = dqr_forward(hidden_vectors, sep_indices, params)
    jax.block_until_ready(psgs_auto)
    np.testing.assert_allclose(np.asarray(psgs_auto), ref, rtol=3e-2, atol=2e-2)

    print("KERNEL_OK")
</pallas_src>

<mosaic_0001>
module attributes {stable_mosaic.version = 11 : i64} {
  func.func @_score_psgs_kernel(%arg0: i32, %arg1: memref<1x2x32x128xbf16, #tpu.memory_space<vmem>>, %arg2: memref<1x2x8x1xi32, #tpu.memory_space<vmem>>, %arg3: memref<1x2x8x1xi32, #tpu.memory_space<vmem>>, %arg4: memref<1x2x8x1xf32, #tpu.memory_space<vmem>>, %arg5: memref<128x128xbf16, #tpu.memory_space<vmem>>, %arg6: memref<1x128xf32, #tpu.memory_space<vmem>>, %arg7: memref<128x1xf32, #tpu.memory_space<vmem>>, %arg8: memref<1x1xf32, #tpu.memory_space<vmem>>, %arg9: memref<1x16x1xf32, #tpu.memory_space<vmem>>) attributes {dimension_semantics = [#tpu.dimension_semantics<parallel>], iteration_bounds = array<i64: 2>, scalar_prefetch = 0 : i64, scratch_operands = 0 : i64, tpu.core_type = #tpu.core_type<tc>, window_params = [{transform_indices = @transform_0, window_bounds = array<i64: 1, 2, 32, 128>}, {transform_indices = @transform_1, window_bounds = array<i64: 1, 2, 8, 1>}, {transform_indices = @transform_2, window_bounds = array<i64: 1, 2, 8, 1>}, {transform_indices = @transform_3, window_bounds = array<i64: 1, 2, 8, 1>}, {pipeline_mode = #tpu.pipeline_mode<synchronous>, transform_indices = @transform_4, window_bounds = array<i64: 128, 128>}, {pipeline_mode = #tpu.pipeline_mode<synchronous>, transform_indices = @transform_5, window_bounds = array<i64: 1, 128>}, {pipeline_mode = #tpu.pipeline_mode<synchronous>, transform_indices = @transform_6, window_bounds = array<i64: 128, 1>}, {pipeline_mode = #tpu.pipeline_mode<synchronous>, transform_indices = @transform_7, window_bounds = array<i64: 1, 1>}, {transform_indices = @transform_8, window_bounds = array<i64: 1, 16, 1>}]} {
    %c0 = arith.constant 0 : index
    %c0_0 = arith.constant 0 : index
    %c0_1 = arith.constant 0 : index
    %c0_2 = arith.constant 0 : index
    %0 = vector.load %arg1[%c0, %c0_0, %c0_1, %c0_2] : memref<1x2x32x128xbf16, #tpu.memory_space<vmem>>, vector<1x2x32x128xbf16>
    %1 = vector.shape_cast %0 : vector<1x2x32x128xbf16> to vector<2x32x128xbf16>
    %c0_3 = arith.constant 0 : index
    %c0_4 = arith.constant 0 : index
    %c0_5 = arith.constant 0 : index
    %c0_6 = arith.constant 0 : index
    %2 = vector.load %arg2[%c0_3, %c0_4, %c0_5, %c0_6] : memref<1x2x8x1xi32, #tpu.memory_space<vmem>>, vector<1x2x8x1xi32>
    %3 = vector.shape_cast %2 : vector<1x2x8x1xi32> to vector<2x8x1xi32>
    %c0_7 = arith.constant 0 : index
    %c0_8 = arith.constant 0 : index
    %c0_9 = arith.constant 0 : index
    %c0_10 = arith.constant 0 : index
    %4 = vector.load %arg3[%c0_7, %c0_8, %c0_9, %c0_10] : memref<1x2x8x1xi32, #tpu.memory_space<vmem>>, vector<1x2x8x1xi32>
    %5 = vector.shape_cast %4 : vector<1x2x8x1xi32> to vector<2x8x1xi32>
    %c0_11 = arith.constant 0 : index
    %c0_12 = arith.constant 0 : index
    %c0_13 = arith.constant 0 : index
    %c0_14 = arith.constant 0 : index
    %6 = vector.load %arg4[%c0_11, %c0_12, %c0_13, %c0_14] : memref<1x2x8x1xf32, #tpu.memory_space<vmem>>, vector<1x2x8x1xf32>
    %7 = vector.shape_cast %6 : vector<1x2x8x1xf32> to vector<2x8x1xf32>
    %8 = tpu.iota {dimensions = array<i32: 2>} : vector<2x8x32xi32>
    %9 = vector.broadcast %3 : vector<2x8x1xi32> to vector<2x8x32xi32>
    %10 = arith.cmpi sgt, %8, %9 : vector<2x8x32xi32>
    %11 = vector.broadcast %5 : vector<2x8x1xi32> to vector<2x8x32xi32>
    %12 = arith.cmpi slt, %8, %11 : vector<2x8x32xi32>
    %13 = arith.andi %10, %12 : vector<2x8x32xi1>
    %cst = arith.constant 1.000000e+00 : f32
    %cst_15 = arith.constant 0.000000e+00 : f32
    %14 = vector.broadcast %cst : f32 to vector<2x8x32xf32>
    %15 = vector.broadcast %cst_15 : f32 to vector<2x8x32xf32>
    %16 = arith.select %13, %14, %15 : vector<2x8x32xi1>, vector<2x8x32xf32>
    %17 = arith.truncf %16 : vector<2x8x32xf32> to vector<2x8x32xbf16>
    "tpu.trace_start"() <{level = 10 : i32, message = "bps,bsh->bph"}> : () -> ()
    %cst_16 = arith.constant dense<0.000000e+00> : vector<2x8x128xf32>
    %18 = tpu.matmul %17, %1, %cst_16 {dimension_numbers = #tpu.dot_dimension_numbers<[2], [1], [1], [2], [0, 0, 0, 1, 1, 2], [0], [0]>} : vector<2x8x32xbf16>, vector<2x32x128xbf16>, vector<2x8x128xf32> -> vector<2x8x128xf32>
    "tpu.trace_stop"() : () -> ()
    %19 = vector.broadcast %7 : vector<2x8x1xf32> to vector<2x8x128xf32>
    %20 = arith.mulf %18, %19 : vector<2x8x128xf32>
    %21 = vector.shape_cast %20 : vector<2x8x128xf32> to vector<16x128xf32>
    %22 = arith.truncf %21 : vector<16x128xf32> to vector<16x128xbf16>
    %c0_17 = arith.constant 0 : index
    %c0_18 = arith.constant 0 : index
    %23 = vector.load %arg5[%c0_17, %c0_18] : memref<128x128xbf16, #tpu.memory_space<vmem>>, vector<128x128xbf16>
    %cst_19 = arith.constant dense<0.000000e+00> : vector<16x128xf32>
    %24 = tpu.matmul %22, %23, %cst_19 {dimension_numbers = #tpu.dot_dimension_numbers<[1], [0], [0], [1], [0, 0, 1, 1], [], []>} : vector<16x128xbf16>, vector<128x128xbf16>, vector<16x128xf32> -> vector<16x128xf32>
    %c0_20 = arith.constant 0 : index
    %c0_21 = arith.constant 0 : index
    %25 = vector.load %arg6[%c0_20, %c0_21] : memref<1x128xf32, #tpu.memory_space<vmem>>, vector<1x128xf32>
    %26 = vector.broadcast %25 : vector<1x128xf32> to vector<16x128xf32>
    %27 = arith.addf %24, %26 : vector<16x128xf32>
    %cst_22 = arith.constant 5.000000e-01 : f32
    %28 = vector.broadcast %cst_22 : f32 to vector<16x128xf32>
    %29 = arith.mulf %28, %27 : vector<16x128xf32>
    %cst_23 = arith.constant 4.471500e-02 : f32
    %30 = vector.broadcast %cst_23 : f32 to vector<16x128xf32>
    %31 = arith.mulf %30, %27 : vector<16x128xf32>
    %32 = arith.mulf %31, %27 : vector<16x128xf32>
    %33 = arith.mulf %32, %27 : vector<16x128xf32>
    %34 = arith.addf %27, %33 : vector<16x128xf32>
    %cst_24 = arith.constant 0.797884583 : f32
    %35 = vector.broadcast %cst_24 : f32 to vector<16x128xf32>
    %36 = arith.mulf %35, %34 : vector<16x128xf32>
    %37 = math.tanh %36 : vector<16x128xf32>
    %cst_25 = arith.constant 1.000000e+00 : f32
    %38 = vector.broadcast %cst_25 : f32 to vector<16x128xf32>
    %39 = arith.addf %38, %37 : vector<16x128xf32>
    %40 = arith.mulf %29, %39 : vector<16x128xf32>
    %cst_26 = arith.constant dense<0.000000e+00> : vector<16xf32>
    %41 = vector.multi_reduction <add>, %40, %cst_26 [1] : vector<16x128xf32> to vector<16xf32>
    %42 = vector.shape_cast %41 : vector<16xf32> to vector<16x1xf32>
    %cst_27 = arith.constant 1.280000e+02 : f32
    %43 = vector.broadcast %cst_27 : f32 to vector<16x1xf32>
    %44 = arith.divf %42, %43 : vector<16x1xf32>
    %45 = arith.mulf %40, %40 : vector<16x128xf32>
    %cst_28 = arith.constant dense<0.000000e+00> : vector<16xf32>
    %46 = vector.multi_reduction <add>, %45, %cst_28 [1] : vector<16x128xf32> to vector<16xf32>
    %47 = vector.shape_cast %46 : vector<16xf32> to vector<16x1xf32>
    %cst_29 = arith.constant 1.280000e+02 : f32
    %48 = vector.broadcast %cst_29 : f32 to vector<16x1xf32>
    %49 = arith.divf %47, %48 : vector<16x1xf32>
    %50 = arith.mulf %44, %44 : vector<16x1xf32>
    %51 = arith.subf %49, %50 : vector<16x1xf32>
    %cst_30 = arith.constant 0.000000e+00 : f32
    %52 = vector.broadcast %cst_30 : f32 to vector<16x1xf32>
    %53 = arith.maximumf %51, %52 : vector<16x1xf32>
    %54 = vector.broadcast %44 : vector<16x1xf32> to vector<16x128xf32>
    %55 = arith.subf %40, %54 : vector<16x128xf32>
    %cst_31 = arith.constant 9.99999996E-13 : f32
    %56 = vector.broadcast %cst_31 : f32 to vector<16x1xf32>
    %57 = arith.addf %53, %56 : vector<16x1xf32>
    %58 = math.rsqrt %57 : vector<16x1xf32>
    %59 = vector.broadcast %58 : vector<16x1xf32> to vector<16x128xf32>
    %60 = arith.mulf %55, %59 : vector<16x128xf32>
    %c0_32 = arith.constant 0 : index
    %c0_33 = arith.constant 0 : index
    %61 = vector.load %arg7[%c0_32, %c0_33] : memref<128x1xf32, #tpu.memory_space<vmem>>, vector<128x1xf32>
    %cst_34 = arith.constant dense<0.000000e+00> : vector<16x1xf32>
    %62 = tpu.matmul %60, %61, %cst_34 {dimension_numbers = #tpu.dot_dimension_numbers<[1], [0], [0], [1], [0, 0, 1, 1], [], []>} : vector<16x128xf32>, vector<128x1xf32>, vector<16x1xf32> -> vector<16x1xf32>
    %c0_35 = arith.constant 0 : index
    %c0_36 = arith.constant 0 : index
    %63 = vector.load %arg8[%c0_35, %c0_36] : memref<1x1xf32, #tpu.memory_space<vmem>>, vector<1x1xf32>
    %64 = vector.broadcast %63 : vector<1x1xf32> to vector<16x1xf32>
    %65 = arith.addf %62, %64 : vector<16x1xf32>
    %c0_37 = arith.constant 0 : index
    %c0_38 = arith.constant 0 : index
    %c0_39 = arith.constant 0 : index
    %66 = vector.load %arg9[%c0_37, %c0_38, %c0_39] : memref<1x16x1xf32, #tpu.memory_space<vmem>>, vector<1x16x1xf32>
    %67 = vector.shape_cast %66 : vector<1x16x1xf32> to vector<16x1xf32>
    %68 = vector.shape_cast %65 : vector<16x1xf32> to vector<1x16x1xf32>
    tpu.vector_store %arg9[%c0_37, %c0_38, %c0_39], %68 {strides = array<i32>} : memref<1x16x1xf32, #tpu.memory_space<vmem>>, vector<1x16x1xf32>,
    return
  }
  func.func @transform_0(%arg0: i32) -> (i32, i32, i32, i32) {
    %c0_i32 = arith.constant 0 : i32
    %c0_i32_0 = arith.constant 0 : i32
    %c0_i32_1 = arith.constant 0 : i32
    %c0_i32_2 = arith.constant 0 : i32
    return %arg0, %c0_i32, %c0_i32_0, %c0_i32_1 : i32, i32, i32, i32
  }
  func.func @transform_1(%arg0: i32) -> (i32, i32, i32, i32) {
    %c0_i32 = arith.constant 0 : i32
    %c0_i32_0 = arith.constant 0 : i32
    %c0_i32_1 = arith.constant 0 : i32
    %c0_i32_2 = arith.constant 0 : i32
    return %arg0, %c0_i32, %c0_i32_0, %c0_i32_1 : i32, i32, i32, i32
  }
  func.func @transform_2(%arg0: i32) -> (i32, i32, i32, i32) {
    %c0_i32 = arith.constant 0 : i32
    %c0_i32_0 = arith.constant 0 : i32
    %c0_i32_1 = arith.constant 0 : i32
    %c0_i32_2 = arith.constant 0 : i32
    return %arg0, %c0_i32, %c0_i32_0, %c0_i32_1 : i32, i32, i32, i32
  }
  func.func @transform_3(%arg0: i32) -> (i32, i32, i32, i32) {
    %c0_i32 = arith.constant 0 : i32
    %c0_i32_0 = arith.constant 0 : i32
    %c0_i32_1 = arith.constant 0 : i32
    %c0_i32_2 = arith.constant 0 : i32
    return %arg0, %c0_i32, %c0_i32_0, %c0_i32_1 : i32, i32, i32, i32
  }
  func.func @transform_4(%arg0: i32) -> (i32, i32) {
    %c0_i32 = arith.constant 0 : i32
    %c0_i32_0 = arith.constant 0 : i32
    %c0_i32_1 = arith.constant 0 : i32
    return %c0_i32, %c0_i32_0 : i32, i32
  }
  func.func @transform_5(%arg0: i32) -> (i32, i32) {
    %c0_i32 = arith.constant 0 : i32
    %c0_i32_0 = arith.constant 0 : i32
    %c0_i32_1 = arith.constant 0 : i32
    return %c0_i32, %c0_i32_0 : i32, i32
  }
  func.func @transform_6(%arg0: i32) -> (i32, i32) {
    %c0_i32 = arith.constant 0 : i32
    %c0_i32_0 = arith.constant 0 : i32
    %c0_i32_1 = arith.constant 0 : i32
    return %c0_i32, %c0_i32_0 : i32, i32
  }
  func.func @transform_7(%arg0: i32) -> (i32, i32) {
    %c0_i32 = arith.constant 0 : i32
    %c0_i32_0 = arith.constant 0 : i32
    %c0_i32_1 = arith.constant 0 : i32
    return %c0_i32, %c0_i32_0 : i32, i32
  }
  func.func @transform_8(%arg0: i32) -> (i32, i32, i32) {
    %c0_i32 = arith.constant 0 : i32
    %c0_i32_0 = arith.constant 0 : i32
    %c0_i32_1 = arith.constant 0 : i32
    return %arg0, %c0_i32, %c0_i32_0 : i32, i32, i32
  }
}

</mosaic_0001>

<bundles_post_ra>
// kernel: tpu_custom_call.1
= control target key start
LH: loop header
LB: loop body
LE: loop exit
PB: predicated region body
PF: predicated region fallthrough
CT: control target
= control target key end

     0   :  { %s1116_s29 = smov 0   ;;  %s1255_s0 = inlined_call_operand.vmem [shape: bf16[2,2,32,128], index: 0, kind: input, shape index: {}]   ;;  %s1256_s1 = inlined_call_operand.vmem [shape: s32[2,2,8,1], index: 1, kind: input, shape index: {}]   ;;  %s1257_s2 = inlined_call_operand.vmem [shape: s32[2,2,8,1], index: 2, kind: input, shape index: {}]   ;;  %s1258_s3 = inlined_call_operand.vmem [shape: f32[2,2,8,1], index: 3, kind: input, shape index: {}]   ;;  %s1259_s4 = inlined_call_operand.vmem [shape: bf16[128,128], index: 4, kind: input, shape index: {}]   ;;  %s1260_s5 = inlined_call_operand.vmem [shape: f32[1,128], index: 5, kind: input, shape index: {}]   ;;  %s1261_s6 = inlined_call_operand.vmem [shape: f32[128,1], index: 6, kind: input, shape index: {}]   ;;  %s1262_s7 = inlined_call_operand.<no memory space> [shape: f32[1,1], index: 7, kind: input, shape index: {}]   ;;  %s1263_s8 = inlined_call_operand.vmem [shape: f32[2,16,1], index: 8, kind: output, shape index: {}]  }
   0x1   :  { %v13_v0 = vstv %s1262_s7 }
   0x2   :  { %14 = vst [vmem:[#allocation2] sm:$0x1] %v13_v0 }
   0x3 LB: > { %s882_s30 = sadd.s32 4294967295, %s1063_s29   ;;  %p886_p0 = scmp.ge.s32.totalorder %s1063_s29, 1  ;;  %s1063_s29 = sphi %s1116_s29, %s20_s29  }
   0x4   : > { %p294_p1 = scmp.lt.s32.totalorder %s1063_s29, 3 }
   0x6   : > { %p295_p2 = pnand %p886_p0, %p294_p1 }
   0x7   : > { %p343_p3 = scmp.lt.s32.totalorder (!%p295_p2), %s882_s30, 1 }
   0x8   : > { %298 = sbr.rel (%p295_p2) target bundleno = 939 (0x3ab), region = 52 }
   0xd   : > { %v1065_v1 = vmov 0   ;;  %s1265_s30 = smov (!%p343_p3, %s882_s30), 1  ;;  %v1066_v2 = vmov 0.0   ;;  %vm1067_vm0 = vmmov 0   ;;  %v383_v13 = vlaneseq  ;;  %v1041_v19 = vld [vmem:[%s1259_s4 + $0x38] sm:$0xff]   ;;  %v1042_v23 = vld [vmem:[%s1259_s4 + $0x30] sm:$0xff]  }
   0xe   : > { %1036 = vset.pattern.permute.xlu1 %v1065_v1  ;;  %1035 = vset.pattern.permute.xlu0 %v1065_v1  ;;  %s1126_s7 = sshll.u32 %s1265_s30, 4  ;;  %s915_s9 = sshll.u32 %s1265_s30, 5  ;;  %vm419_vm4 = vcmask 261120   ;;  %v1043_v25 = vld [vmem:[%s1259_s4 + $0x28] sm:$0xff]   ;;  %v1044_v26 = vld [vmem:[%s1259_s4 + $0x20] sm:$0xff]   ;;  %v1045_v27 = vld [vmem:[%s1259_s4 + $0x18] sm:$0xff]  }
   0xf   : > { %953 = vmatprep.subr.bf16.mxu0 %v1066_v2  ;;  %961 = vmatprep.subr.bf16.mxu1 %v1066_v2  ;;  %s357_s12 = scalar_lea.vmem %s1257_s2, %s1126_s7  ;;  %s347_s15 = scalar_lea.vmem %s1255_s0, %s915_s9  ;;  %v384_v14 = vand.u32 127, %v383_v13  ;;  %v1046_v28 = vld [vmem:[%s1259_s4 + $0x10] sm:$0xff]   ;;  %v1047_v29 = vld [vmem:[%s1259_s4 + $0x8] sm:$0xff]   ;;  %v1048_v30 = vld [vmem:[%s1259_s4] sm:$0xff]   ;;  %vm788_vm8 = vcmask 7168  }
  0x10   : > { %v379_v3 = vld [vmem:[%s357_s12] sm:$0xff]  ;;  %s352_s18 = scalar_lea.vmem %s1256_s1, %s1126_s7  ;;  %v380_v5 = vld [vmem:[%s357_s12 + $0x8] sm:$0xff]  ;;  %s362_s21 = scalar_lea.vmem %s1258_s3, %s1126_s7  ;;  %957 = vmatprep.mubr.msk.bf16.mxu0 %vm1067_vm0, %v1066_v2  ;;  %965 = vmatprep.mubr.msk.bf16.mxu1 %vm1067_vm0, %v1066_v2  ;;  %v1039_v9 = vld [vmem:[%s347_s15 + $0x18] sm:$0xff]  }
  0x11   : > { %394 = vperm.xlu1 %1036, %v379_v3   ;;  %v377_v4 = vld [vmem:[%s352_s18] sm:$0xff]  ;;  %v378_v6 = vld [vmem:[%s352_s18 + $0x8] sm:$0xff]  ;;  %962 = vmatpush3.bf16.msra.mxu1 %v1039_v9  ;;  %v1040_v11 = vld [vmem:[%s347_s15 + $0x10] sm:$0xff]   ;;  %s367_s11 = scalar_lea.vmem %s1263_s8, %s1126_s7 }
  0x12   : > { %386 = vperm.xlu0 %1035, %v377_v4   ;;  %v1037_v7 = vld [vmem:[%s347_s15 + $0x8] sm:$0xff]   ;;  %v1038_v8 = vld [vmem:[%s347_s15] sm:$0xff]   ;;  %963 = vmatprep.subr.bf16.mxu1 %v1066_v2 }
  0x13   : > { %954 = vmatpush3.bf16.msra.mxu0 %v1037_v7  ;;  %v382_v10 = vld [vmem:[%s362_s21 + $0x8] sm:$0xff]  ;;  %v381_v12 = vld [vmem:[%s362_s21] sm:$0xff]  ;;  %v705_v7 = vld [vmem:[%s1261_s6 + $0x78] sm:$0xff] }
  0x14   : > { %955 = vmatprep.subr.bf16.mxu0 %v1066_v2  ;;  %v903_v44 = vld [vmem:[%s1260_s5] ss:$0 sm:$0xff]  ;;  %v703_v9 = vld [vmem:[%s1261_s6 + $0x68] sm:$0xff] }
  0x15   : > { %397 = vperm.xlu1 %1036, %v380_v5   ;;  %964 = vmatpush3.bf16.msra.mxu1 %v1040_v11  ;;  %v701_v11 = vld [vmem:[%s1261_s6 + $0x58] sm:$0xff]  ;;  %v699_v13 = vld [vmem:[%s1261_s6 + $0x48] sm:$0xff] }
  0x16   : > { %389 = vperm.xlu0 %1035, %v378_v6   ;;  %989 = vmatprep.subr.mxu1 %v705_v7 }
  0x17   : > { %956 = vmatpush3.bf16.msra.mxu0 %v1038_v8  ;;  %v704_v8 = vld [vmem:[%s1261_s6 + $0x70] sm:$0xff] }
  0x18   : > { %969 = vmatprep.subr.bf16.mxu0 %v1066_v2 }
  0x19   : > { %525 = vperm.xlu1 %1036, %v382_v10   ;;  %v702_v10 = vld [vmem:[%s1261_s6 + $0x60] sm:$0xff] }
  0x1a   : > { %520 = vperm.xlu0 %1035, %v381_v12   ;;  %v700_v12 = vld [vmem:[%s1261_s6 + $0x50] sm:$0xff] }
  0x8c   : > { %v395_v15 = vpop.permute.xlu1 %394 }
  0x8d   : > { %vm399_vm1 = vcmp.lt.s32.totalorder %v384_v14, %v395_v15  ;;  %v387_v16 = vpop.permute.xlu0 %386  ;;  %v697_v15 = vld [vmem:[%s1261_s6 + $0x38] sm:$0xff] }
  0x8e   : > { %vm391_vm2 = vcmp.gt.s32.totalorder %v384_v14, %v387_v16  ;;  %v696_v16 = vld [vmem:[%s1261_s6 + $0x30] sm:$0xff] }
  0x8f   : > { %vm401_vm3 = vmand %vm391_vm2, %vm399_vm1 }
  0x90   : > { %v403_v17 = vsel %vm401_vm3, 1.0, %v1066_v2  ;;  %v398_v18 = vpop.permute.xlu1 %397 }
  0x91   : > { %v405_v20 = vpack.c.bf16 %v403_v17, %v403_v17  ;;  %vm400_vm5 = vcmp.lt.s32.totalorder %v384_v14, %v398_v18  ;;  %v390_v21 = vpop.permute.xlu0 %389  ;;  %v695_v17 = vld [vmem:[%s1261_s6 + $0x28] sm:$0xff]  ;;  %v694_v18 = vld [vmem:[%s1261_s6 + $0x20] sm:$0xff] }
  0x92   : > { %vm392_vm6 = vcmp.gt.s32.totalorder %v384_v14, %v390_v21  ;;  %v698_v14 = vld [vmem:[%s1261_s6 + $0x40] sm:$0xff]  ;;  %v691_v21 = vld [vmem:[%s1261_s6 + $0x8] sm:$0xff] }
  0x93   : > { %vm402_vm7 = vmand %vm392_vm6, %vm400_vm5  ;;  %958 = vmatmul.mubr.msk.bf16.vlgmr.msra.gmra.mxu0 %vm419_vm4, %v405_v20  ;;  %v692_v20 = vld [vmem:[%s1261_s6 + $0x10] sm:$0xff] }
  0x94   : > { %v404_v22 = vsel %vm402_vm7, 1.0, %v1066_v2  ;;  %970 = vmatpush3.bf16.msra.mxu0 %v1041_v19  ;;  %985 = vmatprep.mubr.msk.bf16.mxu0 %vm1067_vm0, %v1066_v2  ;;  %v526_v33 = vpop.permute.xlu1 %525  ;;  %v693_v19 = vld [vmem:[%s1261_s6 + $0x18] sm:$0xff] }
  0x95   : > { %v406_v24 = vpack.c.bf16 %v404_v22, %v404_v22  ;;  %971 = vmatprep.subr.bf16.mxu0 %v1066_v2  ;;  %v521_v34 = vpop.permute.xlu0 %520  ;;  %v690_v22 = vld [vmem:[%s1261_s6] sm:$0xff] }
  0x97   : > { %966 = vmatmul.mubr.msk.bf16.vlgmr.msra.gmra.mxu1 %vm419_vm4, %v406_v24 }
  0x98   : > { %972 = vmatpush3.bf16.msra.mxu0 %v1042_v23  ;;  %990 = vmatpush3.msra.mxu1 %v705_v7 }
  0x99   : > { %973 = vmatprep.subr.bf16.mxu0 %v1066_v2  ;;  %991 = vmatprep.subr.mxu1 %v704_v8 }
  0x9a   : > { %992 = vmatpush3.msra.mxu1 %v704_v8 }
  0x9b   : > { %993 = vmatprep.subr.mxu1 %v703_v9 }
  0x9c   : > { %974 = vmatpush3.bf16.msra.mxu0 %v1043_v25  ;;  %994 = vmatpush3.msra.mxu1 %v703_v9 }
  0x9d   : > { %975 = vmatprep.subr.bf16.mxu0 %v1066_v2  ;;  %995 = vmatprep.subr.mxu1 %v702_v10 }
  0x9e   : > { %996 = vmatpush3.msra.mxu1 %v702_v10 }
  0x9f   : > { %997 = vmatprep.subr.mxu1 %v701_v11 }
  0xa0   : > { %976 = vmatpush3.bf16.msra.mxu0 %v1044_v26  ;;  %998 = vmatpush3.msra.mxu1 %v701_v11 }
  0xa1   : > { %977 = vmatprep.subr.bf16.mxu0 %v1066_v2  ;;  %999 = vmatprep.subr.mxu1 %v700_v12 }
  0xa2   : > { %1000 = vmatpush3.msra.mxu1 %v700_v12 }
  0xa3   : > { %1001 = vmatprep.subr.mxu1 %v699_v13 }
  0xa4   : > { %978 = vmatpush3.bf16.msra.mxu0 %v1045_v27  ;;  %1002 = vmatpush3.msra.mxu1 %v699_v13 }
  0xa5   : > { %979 = vmatprep.subr.bf16.mxu0 %v1066_v2  ;;  %1003 = vmatprep.subr.mxu1 %v698_v14 }
  0xa6   : > { %1004 = vmatpush3.msra.mxu1 %v698_v14 }
  0xa7   : > { %1005 = vmatprep.subr.mxu1 %v697_v15 }
  0xa8   : > { %980 = vmatpush3.bf16.msra.mxu0 %v1046_v28  ;;  %1006 = vmatpush3.msra.mxu1 %v697_v15 }
  0xa9   : > { %981 = vmatprep.subr.bf16.mxu0 %v1066_v2  ;;  %1007 = vmatprep.subr.mxu1 %v696_v16 }
  0xaa   : > { %1008 = vmatpush3.msra.mxu1 %v696_v16 }
  0xab   : > { %1009 = vmatprep.subr.mxu1 %v695_v17 }
  0xac   : > { %982 = vmatpush3.bf16.msra.mxu0 %v1047_v29  ;;  %1010 = vmatpush3.msra.mxu1 %v695_v17 }
  0xad   : > { %983 = vmatprep.subr.bf16.mxu0 %v1066_v2  ;;  %1011 = vmatprep.subr.mxu1 %v694_v18 }
  0xae   : > { %1012 = vmatpush3.msra.mxu1 %v694_v18 }
  0xaf   : > { %1013 = vmatprep.subr.mxu1 %v693_v19 }
  0xb0   : > { %984 = vmatpush3.bf16.msra.mxu0 %v1048_v30  ;;  %1014 = vmatpush3.msra.mxu1 %v693_v19 }
  0xb1   : > { %1015 = vmatprep.subr.mxu1 %v692_v20 }
  0xb2   : > { %1016 = vmatpush3.msra.mxu1 %v692_v20 }
  0xb3   : > { %1017 = vmatprep.subr.mxu1 %v691_v21 }
  0xb4   : > { %1018 = vmatpush3.msra.mxu1 %v691_v21 }
  0xb5   : > { %1019 = vmatprep.subr.mxu1 %v690_v22 }
  0xb6   : > { %1020 = vmatpush3.msra.mxu1 %v690_v22 }
 0x153   : > { %v457_v31 = vpop.f32.mrf.mxu0 }
 0x154   : > { %v528_v37 = vmul.f32 %v521_v34, %v457_v31 }
 0x155   : > { %v959_v32 = vpop.f32.mrf.mxu0 }
 0x157   : > { %v460_v35 = vpop.f32.mrf.mxu0  ;;  %v512_v36 = vpop.f32.mrf.mxu1 }
 0x158   : > { %v529_v38 = vmul.f32 %v526_v33, %v512_v36 }
 0x159   : > { %v960_v39 = vpop.f32.mrf.mxu0  ;;  %v967_v40 = vpop.f32.mrf.mxu1 }
 0x15a   : > { %v530_v41 = vpack.c.bf16 %v529_v38, %v528_v37 }
 0x15b   : > { %v515_v42 = vpop.f32.mrf.mxu1 }
 0x15c   : > { %986 = vmatmul.mubr.bf16.vlgmr.msra.gmra.mxu0 %v530_v41 }
 0x15d   : > { %v968_v43 = vpop.f32.mrf.mxu1 }
 0x21c   : > { %v636_v45 = vpop.f32.mrf.mxu0 }
 0x21d   : > { %v637_v46 = vadd.f32 %v903_v44, %v636_v45  ;;  %v912_v45 = vld [vmem:[#allocation2] ss:$0 sm:$0xff] }
 0x21e   : > { %v987_v47 = vpop.f32.mrf.mxu0 }
 0x21f   : > { %v645_v48 = vmul.f32 0.044715, %v637_v46  ;;  %v643_v62 = vmul.f32 0.5, %v637_v46 }
 0x220   : > { %v639_v49 = vpop.f32.mrf.mxu0 }
 0x221   : > { %v647_v50 = vmul.f32 %v645_v48, %v637_v46  ;;  %v640_v51 = vadd.f32 %v903_v44, %v639_v49 }
 0x222   : > { %v988_v52 = vpop.f32.mrf.mxu0 }
 0x223   : > { %v646_v53 = vmul.f32 0.044715, %v640_v51  ;;  %v649_v54 = vmul.f32 %v647_v50, %v637_v46  ;;  %v644_v2 = vmul.f32 0.5, %v640_v51 }
 0x225   : > { %v648_v55 = vmul.f32 %v646_v53, %v640_v51  ;;  %v651_v56 = vadd.f32 %v649_v54, %v637_v46 }
 0x227   : > { %v653_v57 = vmul.f32 0.7978846, %v651_v56  ;;  %v650_v58 = vmul.f32 %v648_v55, %v640_v51 }
 0x229   : > { %1049 = vtanh.f32 %v653_v57  ;;  %v652_v59 = vadd.f32 %v650_v58, %v640_v51 }
 0x22b   : > { %v654_v60 = vmul.f32 0.7978846, %v652_v59 }
 0x22d   : > { %1051 = vtanh.f32 %v654_v60 }
 0x236   : > { %v1050_v61 = vpop.eup %1049 }
 0x237   : > { %v657_v63 = vadd.f32 1.0, %v1050_v61 }
 0x239   : > { %v1188_v0 = vmul.f32 %v657_v63, %v643_v62 }
 0x23a   : > { %v1052_v1 = vpop.eup %1051 }
 0x23b   : > { %661 = vadd.xlane.f32.xlu0 %v1188_v0  ;;  %v658_v3 = vadd.f32 1.0, %v1052_v1  ;;  %v668_v4 = vmul.f32 %v1188_v0, %v1188_v0 }
 0x23d   : > { %v1193_v5 = vmul.f32 %v658_v3, %v644_v2 }
 0x23f   : > { %670 = vadd.xlane.f32.xlu0 %v668_v4  ;;  %663 = vadd.xlane.f32.xlu1 %v1193_v5  ;;  %v669_v6 = vmul.f32 %v1193_v5, %v1193_v5 }
 0x243   : > { %672 = vadd.xlane.f32.xlu0 %v669_v6 }
 0x2c4   : > { %v662_v23 = vpop.xlane.xlu0 %661 }
 0x2c5   : > { %v666_v24 = vmul.f32 0.0078125, %v662_v23 }
 0x2c7   : > { %v676_v27 = vmul.f32 %v666_v24, %v666_v24  ;;  %v682_v39 = vsub.f32 %v1188_v0, %v666_v24 }
 0x2c8   : > { %v671_v25 = vpop.xlane.xlu0 %670  ;;  %v664_v26 = vpop.xlane.xlu1 %663 }
 0x2c9   : > { %v674_v28 = vmul.f32 0.0078125, %v671_v25  ;;  %v667_v29 = vmul.f32 0.0078125, %v664_v26 }
 0x2cb   : > { %v678_v30 = vsub.f32 %v674_v28, %v676_v27  ;;  %v677_v33 = vmul.f32 %v667_v29, %v667_v29  ;;  %v683_v42 = vsub.f32 %v1193_v5, %v667_v29 }
 0x2cc   : > { %v673_v31 = vpop.xlane.xlu0 %672 }
 0x2cd   : > { %v680_v32 = vmax.f32 %v678_v30, 0.0  ;;  %v675_v34 = vmul.f32 0.0078125, %v673_v31 }
 0x2cf   : > { %v684_v35 = vadd.f32 1e-12, %v680_v32  ;;  %v679_v36 = vsub.f32 %v675_v34, %v677_v33 }
 0x2d1   : > { %1053 = vrsqrt.f32 %v684_v35  ;;  %v681_v37 = vmax.f32 %v679_v36, 0.0 }
 0x2d3   : > { %v685_v38 = vadd.f32 1e-12, %v681_v37 }
 0x2d5   : > { %1055 = vrsqrt.f32 %v685_v38 }
 0x2de   : > { %v1054_v40 = vpop.eup %1053 }
 0x2df   : > { %v688_v41 = vmul.f32 %v1054_v40, %v682_v39 }
 0x2e1   : > { %1021 = vmatprep.mubr.f32.mxu1 %v688_v41 }
 0x2e2   : > { %v1056_v43 = vpop.eup %1055 }
 0x2e3   : > { %v689_v44 = vmul.f32 %v1056_v43, %v683_v42 }
 0x2e5   : > { %1022 = vmatmul.mubr.f32.vlgmr.msra.gmra.mxu1 %v689_v44 }
 0x3a5   : > { %v1023_v46 = vpop.f32.mrf.mxu1 }
 0x3a6   : > { %v785_v47 = vadd.f32 %v1023_v46, %v912_v45 }
 0x3a7   : > { %v779_v48 = vpop.f32.mrf.mxu1 }
 0x3a8   : > { %790 = vst.msk [vmem:[%s367_s11 + $0x8] sm:$0xff] %vm788_vm8, %v785_v47  ;;  %v780_v49 = vadd.f32 %v912_v45, %v779_v48 }
 0x3aa   : > { %789 = vst.msk [vmem:[%s367_s11] sm:$0xff] %vm788_vm8, %v780_v49 }
 0x3ab PF: > { %s20_s29 = sadd.s32 1, %s1063_s29  }
 0x3ac   : > { %p17_p4 = scmp.ge.s32.totalorder %s20_s29, 4  }
 0x3ae   :  { %19 = sbr.rel (!%p17_p4) target bundleno = 3 (0x3), region = 91 }

</bundles_post_ra>
